<compile_context>
chip_gen: v7x
topology: tpu7x:2x2x1
jax: 0.10.0
libtpu: 0.0.40
codegen_flags: <defaults>
</compile_context>

<pallas_src>
import jax
import jax.numpy as jnp
from jax import lax
from jax.experimental import pallas as pl
from jax.experimental.pallas import tpu as pltpu


def _round_up(x: int, m: int) -> int:
    return ((x + m - 1) // m) * m


def _activation_fn(activation: str):
    if activation in ("relu", "tanh"):  # 'tanh' == ReLU in the original module
        return lambda v: jnp.maximum(v, 0.0)
    if activation == "lrelu":
        return lambda v: jnp.where(v >= 0.0, v, 0.01 * v)  # LeakyReLU(0.01)
    raise ValueError(f"unsupported activation: {activation}")


def _make_kernel(input_dim, n_mid, n_out_pad, activation, compute_dtype,
                 unroll_threshold=16):
    """Fused MLP kernel: first layer (true K) -> hidden stack -> final layer."""
    act = _activation_fn(activation)
    fma_first = input_dim <= 8  # Real-NVP: input_dim is tiny -> pure VPU layer 0

    def mm(lhs, w_val):
        if lhs.dtype != compute_dtype:
            lhs = lhs.astype(compute_dtype)
        return jnp.dot(lhs, w_val, preferred_element_type=jnp.float32)

    def kernel(*refs):
        if n_mid > 0:
            x_ref, wf_ref, bf_ref, wm_ref, bm_ref, wl_ref, bl_ref, o_ref = refs
        else:
            x_ref, wf_ref, bf_ref, wl_ref, bl_ref, o_ref = refs

        x = x_ref[...]  # [tb, input_dim], already f32

        # ---- first layer (K = input_dim, not padded) ----
        if fma_first:
            wf = wf_ref[...].astype(jnp.float32)         # [input_dim, Hp]
            h = x[:, 0:1] * wf[0:1, :]
            for d in range(1, input_dim):
                h = h + x[:, d:d + 1] * wf[d:d + 1, :]
            h = h + bf_ref[...]
        else:
            h = mm(x, wf_ref[...]) + bf_ref[...]
        h = act(h)

        # ---- hidden layers (stacked [n_mid, Hp, Hp]) ----
        if n_mid > 0:
            if n_mid <= unroll_threshold:
                for i in range(n_mid):
                    h = act(mm(h, wm_ref[i]) + bm_ref[i])
            else:
                def body(i, hh):
                    return act(mm(hh, wm_ref[i]) + bm_ref[i])
                h = lax.fori_loop(0, n_mid, body, h, unroll=4)

        # ---- final layer (N padded to 128 lanes, store only input_dim) ----
        y = mm(h, wl_ref[...]) + bl_ref[...]
        if n_out_pad != input_dim:
            y = y[:, :input_dim]
        o_ref[...] = y.astype(o_ref.dtype)

    return kernel


def tnetwork_forward(x, params, *, activation="relu", block_batch=1024,
                     weights_dtype=jnp.float32):
    """Fused TNetwork forward pass.

    Args:
      x: [batch, inputDim] array.
      params: list of (W, b) in layer order; W is [in, out], b is [out].
      activation: 'relu' | 'tanh' | 'lrelu' ('tanh' maps to ReLU, as in the module).
      block_batch: target batch tile size.
      weights_dtype: jnp.float32 (default) or jnp.bfloat16 (f32 accumulation).
    Returns:
      [batch, inputDim] float32.
    """
    f32 = jnp.float32
    batch, input_dim = x.shape
    n_layers = len(params)
    assert n_layers >= 2, "TNetwork has at least first + final layers"
    n_mid = n_layers - 2

    hidden_dim = params[0][0].shape[1]
    hp = _round_up(hidden_dim, 128)          # lane-dense hidden width
    npad = _round_up(input_dim, 128)         # lane-dense final-matmul N
    wdt = jnp.dtype(weights_dtype)

    # ---------------- pack weights (first / hidden-stack / last) -------------
    w0, b0 = params[0]
    wN, bN = params[-1]
    w_first = jnp.zeros((input_dim, hp), wdt).at[:, :hidden_dim].set(w0.astype(wdt))
    b_first = jnp.zeros((1, hp), f32).at[0, :hidden_dim].set(b0.astype(f32))
    w_last = jnp.zeros((hp, npad), wdt).at[:hidden_dim, :input_dim].set(wN.astype(wdt))
    b_last = jnp.zeros((1, npad), f32).at[0, :input_dim].set(bN.astype(f32))
    if n_mid > 0:
        w_mid = jnp.zeros((n_mid, hp, hp), wdt)
        b_mid = jnp.zeros((n_mid, 1, hp), f32)
        for i in range(n_mid):
            w, b = params[1 + i]
            w_mid = w_mid.at[i, :hidden_dim, :hidden_dim].set(w.astype(wdt))
            b_mid = b_mid.at[i, 0, :hidden_dim].set(b.astype(f32))

    # ---------------- batch tiling -------------------------------------------
    n_steps = max(1, pl.cdiv(batch, block_batch))
    if batch >= 512 and n_steps < 2:
        n_steps = 2                       # give v7x's 2 TensorCores work
    tb = _round_up(pl.cdiv(batch, n_steps), 8)

    w_bytes = wdt.itemsize * (input_dim * hp + n_mid * hp * hp + hp * npad)
    b_bytes = 4 * (hp * (n_mid + 1) + npad)

    def vmem_estimate(tb_):
        io = 2 * 2 * tb_ * input_dim * 4       # x & out tiles, double-buffered
        interm = 4 * tb_ * hp * 4              # h working set headroom
        return w_bytes + b_bytes + io + interm

    VMEM_BUDGET = 44 * (1 << 20)               # leaves headroom under v7x's 64 MiB
    while vmem_estimate(tb) > VMEM_BUDGET and tb > 8:
        tb = max(8, _round_up(tb // 2, 8))

    grid_n = pl.cdiv(batch, tb)
    b_pad = grid_n * tb

    if x.dtype != f32:
        x = x.astype(f32)
    x_in = x if b_pad == batch else jnp.zeros((b_pad, input_dim), f32).at[:batch].set(x)

    est = vmem_estimate(tb)
    vmem_limit = None
    if est > 30 * (1 << 20):
        vmem_limit = int(min(est * 1.25 + (4 << 20), 100 << 20))

    kernel = _make_kernel(input_dim, n_mid, npad, activation, wdt)

    # Padded-compute cost (what the kernel actually does).
    flops = 2 * b_pad * (input_dim * hp + n_mid * hp * hp + hp * npad)
    bytes_accessed = 4 * (2 * b_pad * input_dim) + w_bytes + b_bytes
    cost = pl.CostEstimate(flops=flops, transcendentals=0,
                           bytes_accessed=bytes_accessed)

    def _build_and_run(single_buffer_weights: bool):
        def const_spec(shape):
            zero_map = lambda i, _n=len(shape): (0,) * _n
            if single_buffer_weights:
                # Grid-invariant block: single buffer halves its VMEM footprint.
                return pl.BlockSpec(shape, zero_map, pipeline_mode=pl.Buffered(1))
            return pl.BlockSpec(shape, zero_map)

        in_specs = [pl.BlockSpec((tb, input_dim), lambda i: (i, 0)),   # x tile
                    const_spec((input_dim, hp)),                       # W first
                    const_spec((1, hp))]                               # b first
        args = [x_in, w_first, b_first]
        if n_mid > 0:
            in_specs += [const_spec((n_mid, hp, hp)),                  # W hidden stack
                         const_spec((n_mid, 1, hp))]                   # b hidden stack
            args += [w_mid, b_mid]
        in_specs += [const_spec((hp, npad)),                           # W last
                     const_spec((1, npad))]                            # b last
        args += [w_last, b_last]

        out = pl.pallas_call(
            kernel,
            out_shape=jax.ShapeDtypeStruct((b_pad, input_dim), f32),
            grid=(grid_n,),
            in_specs=in_specs,
            out_specs=pl.BlockSpec((tb, input_dim), lambda i: (i, 0)),
            compiler_params=pltpu.CompilerParams(
                dimension_semantics=("parallel",),
                vmem_limit_bytes=vmem_limit),
            cost_estimate=cost,
        )(*args)
        return jax.block_until_ready(out)

    try:
        out = _build_and_run(single_buffer_weights=True)
    except Exception:
        # Fallback for jax versions without pipeline_mode=pl.Buffered(1).
        out = _build_and_run(single_buffer_weights=False)

    return out if b_pad == batch else out[:batch]


def init_tnetwork_params(key, input_dim, intermediate_dim, number_of_t_layers):
    """Deterministic init mimicking PyTorch Linear default init.

    Returns list of (W, b) with W stored as [in_features, out_features].
    """
    dims = (
        [(input_dim, intermediate_dim)]
        + [(intermediate_dim, intermediate_dim)] * number_of_t_layers
        + [(intermediate_dim, input_dim)]
    )
    params = []
    for fan_in, fan_out in dims:
        key, kw, kb = jax.random.split(key, 3)
        bound = 1.0 / jnp.sqrt(jnp.float32(fan_in))
        w = jax.random.uniform(kw, (fan_in, fan_out), jnp.float32,
                               minval=-bound, maxval=bound)
        b = jax.random.uniform(kb, (fan_out,), jnp.float32,
                               minval=-bound, maxval=bound)
        params.append((w, b))
    return params


def tnetwork_reference(x, params, *, activation="relu"):
    """Pure-JAX reference for validation."""
    act = _activation_fn(activation)
    h = x.astype(jnp.float32)
    n = len(params)
    for i, (w, b) in enumerate(params):
        h = h @ w.astype(jnp.float32) + b.astype(jnp.float32)
        if i < n - 1:
            h = act(h)
    return h


if __name__ == "__main__":
    # Real-NVP 2D: tiny input dimension, modest hidden width.
    input_dim = 2
    intermediate_dim = 32
    number_of_t_layers = 2

    key = jax.random.PRNGKey(0)
    key, kx, kx2 = jax.random.split(key, 3)
    params = init_tnetwork_params(key, input_dim, intermediate_dim,
                                  number_of_t_layers)

    ok = True

    # Small batch (grid of 1), all activation flavors, f32 weights.
    x = jax.random.normal(kx, (8, input_dim), dtype=jnp.float32)
    for activation in ("relu", "tanh", "lrelu"):
        out = jax.block_until_ready(tnetwork_forward(x, params, activation=activation))
        ref = tnetwork_reference(x, params, activation=activation)
        ok &= out.shape == (8, input_dim)
        ok &= bool(jnp.allclose(out, ref, atol=1e-5, rtol=1e-5))

    # Multi-step batch grid (uneven batch -> padded rows + 3 grid steps).
    x_big = jax.random.normal(kx2, (300, input_dim), dtype=jnp.float32)
    out_big = jax.block_until_ready(
        tnetwork_forward(x_big, params, activation="lrelu", block_batch=128))
    ref_big = tnetwork_reference(x_big, params, activation="lrelu")
    ok &= out_big.shape == (300, input_dim)
    ok &= bool(jnp.allclose(out_big, ref_big, atol=1e-5, rtol=1e-5))

    # Optional bf16 weight path (f32 accumulation) — loose tolerance.
    out_bf16 = jax.block_until_ready(
        tnetwork_forward(x, params, activation="relu", weights_dtype=jnp.bfloat16))
    ref_f32 = tnetwork_reference(x, params, activation="relu")
    ok &= bool(jnp.allclose(out_bf16, ref_f32, atol=5e-2, rtol=5e-2))

    assert ok, "mismatch vs reference"
    print("KERNEL_OK")
</pallas_src>

<mosaic_0001>
module attributes {stable_mosaic.version = 11 : i64} {
  func.func @kernel(%arg0: i32, %arg1: memref<8x2xf32, #tpu.memory_space<vmem>>, %arg2: memref<2x128xf32, #tpu.memory_space<vmem>>, %arg3: memref<1x128xf32, #tpu.memory_space<vmem>>, %arg4: memref<2x128x128xf32, #tpu.memory_space<vmem>>, %arg5: memref<2x1x128xf32, #tpu.memory_space<vmem>>, %arg6: memref<128x128xf32, #tpu.memory_space<vmem>>, %arg7: memref<1x128xf32, #tpu.memory_space<vmem>>, %arg8: memref<8x2xf32, #tpu.memory_space<vmem>>) attributes {dimension_semantics = [#tpu.dimension_semantics<parallel>], iteration_bounds = array<i64: 1>, scalar_prefetch = 0 : i64, scratch_operands = 0 : i64, tpu.core_type = #tpu.core_type<tc>, window_params = [{transform_indices = @transform_0, window_bounds = array<i64: 8, 2>}, {pipeline_mode = #tpu.pipeline_mode<synchronous>, transform_indices = @transform_1, window_bounds = array<i64: 2, 128>}, {pipeline_mode = #tpu.pipeline_mode<synchronous>, transform_indices = @transform_2, window_bounds = array<i64: 1, 128>}, {pipeline_mode = #tpu.pipeline_mode<synchronous>, transform_indices = @transform_3, window_bounds = array<i64: 2, 128, 128>}, {pipeline_mode = #tpu.pipeline_mode<synchronous>, transform_indices = @transform_4, window_bounds = array<i64: 2, 1, 128>}, {pipeline_mode = #tpu.pipeline_mode<synchronous>, transform_indices = @transform_5, window_bounds = array<i64: 128, 128>}, {pipeline_mode = #tpu.pipeline_mode<synchronous>, transform_indices = @transform_6, window_bounds = array<i64: 1, 128>}, {transform_indices = @transform_7, window_bounds = array<i64: 8, 2>}]} {
    %c0 = arith.constant 0 : index
    %c0_0 = arith.constant 0 : index
    %0 = vector.load %arg1[%c0, %c0_0] : memref<8x2xf32, #tpu.memory_space<vmem>>, vector<8x2xf32>
    %c0_1 = arith.constant 0 : index
    %c0_2 = arith.constant 0 : index
    %1 = vector.load %arg2[%c0_1, %c0_2] : memref<2x128xf32, #tpu.memory_space<vmem>>, vector<2x128xf32>
    %2 = vector.extract_strided_slice %0 {offsets = [0, 0], sizes = [8, 1], strides = [1, 1]} : vector<8x2xf32> to vector<8x1xf32>
    %3 = vector.extract_strided_slice %1 {offsets = [0, 0], sizes = [1, 128], strides = [1, 1]} : vector<2x128xf32> to vector<1x128xf32>
    %4 = vector.broadcast %2 : vector<8x1xf32> to vector<8x128xf32>
    %5 = vector.broadcast %3 : vector<1x128xf32> to vector<8x128xf32>
    %6 = arith.mulf %4, %5 : vector<8x128xf32>
    %7 = vector.extract_strided_slice %0 {offsets = [0, 1], sizes = [8, 1], strides = [1, 1]} : vector<8x2xf32> to vector<8x1xf32>
    %8 = vector.extract_strided_slice %1 {offsets = [1, 0], sizes = [1, 128], strides = [1, 1]} : vector<2x128xf32> to vector<1x128xf32>
    %9 = vector.broadcast %7 : vector<8x1xf32> to vector<8x128xf32>
    %10 = vector.broadcast %8 : vector<1x128xf32> to vector<8x128xf32>
    %11 = arith.mulf %9, %10 : vector<8x128xf32>
    %12 = arith.addf %6, %11 : vector<8x128xf32>
    %c0_3 = arith.constant 0 : index
    %c0_4 = arith.constant 0 : index
    %13 = vector.load %arg3[%c0_3, %c0_4] : memref<1x128xf32, #tpu.memory_space<vmem>>, vector<1x128xf32>
    %14 = vector.broadcast %13 : vector<1x128xf32> to vector<8x128xf32>
    %15 = arith.addf %12, %14 : vector<8x128xf32>
    %cst = arith.constant 0.000000e+00 : f32
    %16 = vector.broadcast %cst : f32 to vector<8x128xf32>
    %17 = arith.maximumf %15, %16 : vector<8x128xf32>
    %c0_5 = arith.constant 0 : index
    %c0_6 = arith.constant 0 : index
    %c0_7 = arith.constant 0 : index
    %18 = vector.load %arg4[%c0_5, %c0_6, %c0_7] : memref<2x128x128xf32, #tpu.memory_space<vmem>>, vector<1x128x128xf32>
    %19 = vector.shape_cast %18 : vector<1x128x128xf32> to vector<128x128xf32>
    %cst_8 = arith.constant dense<0.000000e+00> : vector<8x128xf32>
    %20 = tpu.matmul %17, %19, %cst_8 {dimension_numbers = #tpu.dot_dimension_numbers<[1], [0], [0], [1], [0, 0, 1, 1], [], []>} : vector<8x128xf32>, vector<128x128xf32>, vector<8x128xf32> -> vector<8x128xf32>
    %c0_9 = arith.constant 0 : index
    %c0_10 = arith.constant 0 : index
    %c0_11 = arith.constant 0 : index
    %21 = vector.load %arg5[%c0_9, %c0_10, %c0_11] : memref<2x1x128xf32, #tpu.memory_space<vmem>>, vector<1x1x128xf32>
    %22 = vector.shape_cast %21 : vector<1x1x128xf32> to vector<1x128xf32>
    %23 = vector.broadcast %22 : vector<1x128xf32> to vector<8x128xf32>
    %24 = arith.addf %20, %23 : vector<8x128xf32>
    %cst_12 = arith.constant 0.000000e+00 : f32
    %25 = vector.broadcast %cst_12 : f32 to vector<8x128xf32>
    %26 = arith.maximumf %24, %25 : vector<8x128xf32>
    %c1 = arith.constant 1 : index
    %c0_13 = arith.constant 0 : index
    %c0_14 = arith.constant 0 : index
    %27 = vector.load %arg4[%c1, %c0_13, %c0_14] : memref<2x128x128xf32, #tpu.memory_space<vmem>>, vector<1x128x128xf32>
    %28 = vector.shape_cast %27 : vector<1x128x128xf32> to vector<128x128xf32>
    %cst_15 = arith.constant dense<0.000000e+00> : vector<8x128xf32>
    %29 = tpu.matmul %26, %28, %cst_15 {dimension_numbers = #tpu.dot_dimension_numbers<[1], [0], [0], [1], [0, 0, 1, 1], [], []>} : vector<8x128xf32>, vector<128x128xf32>, vector<8x128xf32> -> vector<8x128xf32>
    %c1_16 = arith.constant 1 : index
    %c0_17 = arith.constant 0 : index
    %c0_18 = arith.constant 0 : index
    %30 = vector.load %arg5[%c1_16, %c0_17, %c0_18] : memref<2x1x128xf32, #tpu.memory_space<vmem>>, vector<1x1x128xf32>
    %31 = vector.shape_cast %30 : vector<1x1x128xf32> to vector<1x128xf32>
    %32 = vector.broadcast %31 : vector<1x128xf32> to vector<8x128xf32>
    %33 = arith.addf %29, %32 : vector<8x128xf32>
    %cst_19 = arith.constant 0.000000e+00 : f32
    %34 = vector.broadcast %cst_19 : f32 to vector<8x128xf32>
    %35 = arith.maximumf %33, %34 : vector<8x128xf32>
    %c0_20 = arith.constant 0 : index
    %c0_21 = arith.constant 0 : index
    %36 = vector.load %arg6[%c0_20, %c0_21] : memref<128x128xf32, #tpu.memory_space<vmem>>, vector<128x128xf32>
    %cst_22 = arith.constant dense<0.000000e+00> : vector<8x128xf32>
    %37 = tpu.matmul %35, %36, %cst_22 {dimension_numbers = #tpu.dot_dimension_numbers<[1], [0], [0], [1], [0, 0, 1, 1], [], []>} : vector<8x128xf32>, vector<128x128xf32>, vector<8x128xf32> -> vector<8x128xf32>
    %c0_23 = arith.constant 0 : index
    %c0_24 = arith.constant 0 : index
    %38 = vector.load %arg7[%c0_23, %c0_24] : memref<1x128xf32, #tpu.memory_space<vmem>>, vector<1x128xf32>
    %39 = vector.broadcast %38 : vector<1x128xf32> to vector<8x128xf32>
    %40 = arith.addf %37, %39 : vector<8x128xf32>
    %41 = vector.extract_strided_slice %40 {offsets = [0, 0], sizes = [8, 2], strides = [1, 1]} : vector<8x128xf32> to vector<8x2xf32>
    %c0_25 = arith.constant 0 : index
    %c0_26 = arith.constant 0 : index
    %42 = vector.load %arg8[%c0_25, %c0_26] : memref<8x2xf32, #tpu.memory_space<vmem>>, vector<8x2xf32>
    tpu.vector_store %arg8[%c0_25, %c0_26], %41 {strides = array<i32>} : memref<8x2xf32, #tpu.memory_space<vmem>>, vector<8x2xf32>,
    return
  }
  func.func @transform_0(%arg0: i32) -> (i32, i32) {
    %c0_i32 = arith.constant 0 : i32
    %c0_i32_0 = arith.constant 0 : i32
    return %arg0, %c0_i32 : i32, i32
  }
  func.func @transform_1(%arg0: i32) -> (i32, i32) {
    %c0_i32 = arith.constant 0 : i32
    %c0_i32_0 = arith.constant 0 : i32
    %c0_i32_1 = arith.constant 0 : i32
    return %c0_i32, %c0_i32_0 : i32, i32
  }
  func.func @transform_2(%arg0: i32) -> (i32, i32) {
    %c0_i32 = arith.constant 0 : i32
    %c0_i32_0 = arith.constant 0 : i32
    %c0_i32_1 = arith.constant 0 : i32
    return %c0_i32, %c0_i32_0 : i32, i32
  }
  func.func @transform_3(%arg0: i32) -> (i32, i32, i32) {
    %c0_i32 = arith.constant 0 : i32
    %c0_i32_0 = arith.constant 0 : i32
    %c0_i32_1 = arith.constant 0 : i32
    %c0_i32_2 = arith.constant 0 : i32
    return %c0_i32, %c0_i32_0, %c0_i32_1 : i32, i32, i32
  }
  func.func @transform_4(%arg0: i32) -> (i32, i32, i32) {
    %c0_i32 = arith.constant 0 : i32
    %c0_i32_0 = arith.constant 0 : i32
    %c0_i32_1 = arith.constant 0 : i32
    %c0_i32_2 = arith.constant 0 : i32
    return %c0_i32, %c0_i32_0, %c0_i32_1 : i32, i32, i32
  }
  func.func @transform_5(%arg0: i32) -> (i32, i32) {
    %c0_i32 = arith.constant 0 : i32
    %c0_i32_0 = arith.constant 0 : i32
    %c0_i32_1 = arith.constant 0 : i32
    return %c0_i32, %c0_i32_0 : i32, i32
  }
  func.func @transform_6(%arg0: i32) -> (i32, i32) {
    %c0_i32 = arith.constant 0 : i32
    %c0_i32_0 = arith.constant 0 : i32
    %c0_i32_1 = arith.constant 0 : i32
    return %c0_i32, %c0_i32_0 : i32, i32
  }
  func.func @transform_7(%arg0: i32) -> (i32, i32) {
    %c0_i32 = arith.constant 0 : i32
    %c0_i32_0 = arith.constant 0 : i32
    return %arg0, %c0_i32 : i32, i32
  }
}

module attributes {stable_mosaic.version = 11 : i64} {
  func.func @kernel(%arg0: i32, %arg1: memref<8x2xf32, #tpu.memory_space<vmem>>, %arg2: memref<2x128xf32, #tpu.memory_space<vmem>>, %arg3: memref<1x128xf32, #tpu.memory_space<vmem>>, %arg4: memref<2x128x128xf32, #tpu.memory_space<vmem>>, %arg5: memref<2x1x128xf32, #tpu.memory_space<vmem>>, %arg6: memref<128x128xf32, #tpu.memory_space<vmem>>, %arg7: memref<1x128xf32, #tpu.memory_space<vmem>>, %arg8: memref<8x2xf32, #tpu.memory_space<vmem>>) attributes {dimension_semantics = [#tpu.dimension_semantics<parallel>], iteration_bounds = array<i64: 1>, scalar_prefetch = 0 : i64, scratch_operands = 0 : i64, tpu.core_type = #tpu.core_type<tc>, window_params = [{transform_indices = @transform_0, window_bounds = array<i64: 8, 2>}, {pipeline_mode = #tpu.pipeline_mode<synchronous>, transform_indices = @transform_1, window_bounds = array<i64: 2, 128>}, {pipeline_mode = #tpu.pipeline_mode<synchronous>, transform_indices = @transform_2, window_bounds = array<i64: 1, 128>}, {pipeline_mode = #tpu.pipeline_mode<synchronous>, transform_indices = @transform_3, window_bounds = array<i64: 2, 128, 128>}, {pipeline_mode = #tpu.pipeline_mode<synchronous>, transform_indices = @transform_4, window_bounds = array<i64: 2, 1, 128>}, {pipeline_mode = #tpu.pipeline_mode<synchronous>, transform_indices = @transform_5, window_bounds = array<i64: 128, 128>}, {pipeline_mode = #tpu.pipeline_mode<synchronous>, transform_indices = @transform_6, window_bounds = array<i64: 1, 128>}, {transform_indices = @transform_7, window_bounds = array<i64: 8, 2>}]} {
    %c0 = arith.constant 0 : index
    %c0_0 = arith.constant 0 : index
    %0 = vector.load %arg1[%c0, %c0_0] : memref<8x2xf32, #tpu.memory_space<vmem>>, vector<8x2xf32>
    %c0_1 = arith.constant 0 : index
    %c0_2 = arith.constant 0 : index
    %1 = vector.load %arg2[%c0_1, %c0_2] : memref<2x128xf32, #tpu.memory_space<vmem>>, vector<2x128xf32>
    %2 = vector.extract_strided_slice %0 {offsets = [0, 0], sizes = [8, 1], strides = [1, 1]} : vector<8x2xf32> to vector<8x1xf32>
    %3 = vector.extract_strided_slice %1 {offsets = [0, 0], sizes = [1, 128], strides = [1, 1]} : vector<2x128xf32> to vector<1x128xf32>
    %4 = vector.broadcast %2 : vector<8x1xf32> to vector<8x128xf32>
    %5 = vector.broadcast %3 : vector<1x128xf32> to vector<8x128xf32>
    %6 = arith.mulf %4, %5 : vector<8x128xf32>
    %7 = vector.extract_strided_slice %0 {offsets = [0, 1], sizes = [8, 1], strides = [1, 1]} : vector<8x2xf32> to vector<8x1xf32>
    %8 = vector.extract_strided_slice %1 {offsets = [1, 0], sizes = [1, 128], strides = [1, 1]} : vector<2x128xf32> to vector<1x128xf32>
    %9 = vector.broadcast %7 : vector<8x1xf32> to vector<8x128xf32>
    %10 = vector.broadcast %8 : vector<1x128xf32> to vector<8x128xf32>
    %11 = arith.mulf %9, %10 : vector<8x128xf32>
    %12 = arith.addf %6, %11 : vector<8x128xf32>
    %c0_3 = arith.constant 0 : index
    %c0_4 = arith.constant 0 : index
    %13 = vector.load %arg3[%c0_3, %c0_4] : memref<1x128xf32, #tpu.memory_space<vmem>>, vector<1x128xf32>
    %14 = vector.broadcast %13 : vector<1x128xf32> to vector<8x128xf32>
    %15 = arith.addf %12, %14 : vector<8x128xf32>
    %cst = arith.constant 0.000000e+00 : f32
    %16 = vector.broadcast %cst : f32 to vector<8x128xf32>
    %17 = arith.maximumf %15, %16 : vector<8x128xf32>
    %c0_5 = arith.constant 0 : index
    %c0_6 = arith.constant 0 : index
    %c0_7 = arith.constant 0 : index
    %18 = vector.load %arg4[%c0_5, %c0_6, %c0_7] : memref<2x128x128xf32, #tpu.memory_space<vmem>>, vector<1x128x128xf32>
    %19 = vector.shape_cast %18 : vector<1x128x128xf32> to vector<128x128xf32>
    %cst_8 = arith.constant dense<0.000000e+00> : vector<8x128xf32>
    %20 = tpu.matmul %17, %19, %cst_8 {dimension_numbers = #tpu.dot_dimension_numbers<[1], [0], [0], [1], [0, 0, 1, 1], [], []>} : vector<8x128xf32>, vector<128x128xf32>, vector<8x128xf32> -> vector<8x128xf32>
    %c0_9 = arith.constant 0 : index
    %c0_10 = arith.constant 0 : index
    %c0_11 = arith.constant 0 : index
    %21 = vector.load %arg5[%c0_9, %c0_10, %c0_11] : memref<2x1x128xf32, #tpu.memory_space<vmem>>, vector<1x1x128xf32>
    %22 = vector.shape_cast %21 : vector<1x1x128xf32> to vector<1x128xf32>
    %23 = vector.broadcast %22 : vector<1x128xf32> to vector<8x128xf32>
    %24 = arith.addf %20, %23 : vector<8x128xf32>
    %cst_12 = arith.constant 0.000000e+00 : f32
    %25 = vector.broadcast %cst_12 : f32 to vector<8x128xf32>
    %26 = arith.maximumf %24, %25 : vector<8x128xf32>
    %c1 = arith.constant 1 : index
    %c0_13 = arith.constant 0 : index
    %c0_14 = arith.constant 0 : index
    %27 = vector.load %arg4[%c1, %c0_13, %c0_14] : memref<2x128x128xf32, #tpu.memory_space<vmem>>, vector<1x128x128xf32>
    %28 = vector.shape_cast %27 : vector<1x128x128xf32> to vector<128x128xf32>
    %cst_15 = arith.constant dense<0.000000e+00> : vector<8x128xf32>
    %29 = tpu.matmul %26, %28, %cst_15 {dimension_numbers = #tpu.dot_dimension_numbers<[1], [0], [0], [1], [0, 0, 1, 1], [], []>} : vector<8x128xf32>, vector<128x128xf32>, vector<8x128xf32> -> vector<8x128xf32>
    %c1_16 = arith.constant 1 : index
    %c0_17 = arith.constant 0 : index
    %c0_18 = arith.constant 0 : index
    %30 = vector.load %arg5[%c1_16, %c0_17, %c0_18] : memref<2x1x128xf32, #tpu.memory_space<vmem>>, vector<1x1x128xf32>
    %31 = vector.shape_cast %30 : vector<1x1x128xf32> to vector<1x128xf32>
    %32 = vector.broadcast %31 : vector<1x128xf32> to vector<8x128xf32>
    %33 = arith.addf %29, %32 : vector<8x128xf32>
    %cst_19 = arith.constant 0.000000e+00 : f32
    %34 = vector.broadcast %cst_19 : f32 to vector<8x128xf32>
    %35 = arith.maximumf %33, %34 : vector<8x128xf32>
    %c0_20 = arith.constant 0 : index
    %c0_21 = arith.constant 0 : index
    %36 = vector.load %arg6[%c0_20, %c0_21] : memref<128x128xf32, #tpu.memory_space<vmem>>, vector<128x128xf32>
    %cst_22 = arith.constant dense<0.000000e+00> : vector<8x128xf32>
    %37 = tpu.matmul %35, %36, %cst_22 {dimension_numbers = #tpu.dot_dimension_numbers<[1], [0], [0], [1], [0, 0, 1, 1], [], []>} : vector<8x128xf32>, vector<128x128xf32>, vector<8x128xf32> -> vector<8x128xf32>
    %c0_23 = arith.constant 0 : index
    %c0_24 = arith.constant 0 : index
    %38 = vector.load %arg7[%c0_23, %c0_24] : memref<1x128xf32, #tpu.memory_space<vmem>>, vector<1x128xf32>
    %39 = vector.broadcast %38 : vector<1x128xf32> to vector<8x128xf32>
    %40 = arith.addf %37, %39 : vector<8x128xf32>
    %41 = vector.extract_strided_slice %40 {offsets = [0, 0], sizes = [8, 2], strides = [1, 1]} : vector<8x128xf32> to vector<8x2xf32>
    %c0_25 = arith.constant 0 : index
    %c0_26 = arith.constant 0 : index
    %42 = vector.load %arg8[%c0_25, %c0_26] : memref<8x2xf32, #tpu.memory_space<vmem>>, vector<8x2xf32>
    tpu.vector_store %arg8[%c0_25, %c0_26], %41 {strides = array<i32>} : memref<8x2xf32, #tpu.memory_space<vmem>>, vector<8x2xf32>,
    return
  }
  func.func @transform_0(%arg0: i32) -> (i32, i32) {
    %c0_i32 = arith.constant 0 : i32
    %c0_i32_0 = arith.constant 0 : i32
    return %arg0, %c0_i32 : i32, i32
  }
  func.func @transform_1(%arg0: i32) -> (i32, i32) {
    %c0_i32 = arith.constant 0 : i32
    %c0_i32_0 = arith.constant 0 : i32
    %c0_i32_1 = arith.constant 0 : i32
    return %c0_i32, %c0_i32_0 : i32, i32
  }
  func.func @transform_2(%arg0: i32) -> (i32, i32) {
    %c0_i32 = arith.constant 0 : i32
    %c0_i32_0 = arith.constant 0 : i32
    %c0_i32_1 = arith.constant 0 : i32
    return %c0_i32, %c0_i32_0 : i32, i32
  }
  func.func @transform_3(%arg0: i32) -> (i32, i32, i32) {
    %c0_i32 = arith.constant 0 : i32
    %c0_i32_0 = arith.constant 0 : i32
    %c0_i32_1 = arith.constant 0 : i32
    %c0_i32_2 = arith.constant 0 : i32
    return %c0_i32, %c0_i32_0, %c0_i32_1 : i32, i32, i32
  }
  func.func @transform_4(%arg0: i32) -> (i32, i32, i32) {
    %c0_i32 = arith.constant 0 : i32
    %c0_i32_0 = arith.constant 0 : i32
    %c0_i32_1 = arith.constant 0 : i32
    %c0_i32_2 = arith.constant 0 : i32
    return %c0_i32, %c0_i32_0, %c0_i32_1 : i32, i32, i32
  }
  func.func @transform_5(%arg0: i32) -> (i32, i32) {
    %c0_i32 = arith.constant 0 : i32
    %c0_i32_0 = arith.constant 0 : i32
    %c0_i32_1 = arith.constant 0 : i32
    return %c0_i32, %c0_i32_0 : i32, i32
  }
  func.func @transform_6(%arg0: i32) -> (i32, i32) {
    %c0_i32 = arith.constant 0 : i32
    %c0_i32_0 = arith.constant 0 : i32
    %c0_i32_1 = arith.constant 0 : i32
    return %c0_i32, %c0_i32_0 : i32, i32
  }
  func.func @transform_7(%arg0: i32) -> (i32, i32) {
    %c0_i32 = arith.constant 0 : i32
    %c0_i32_0 = arith.constant 0 : i32
    return %arg0, %c0_i32 : i32, i32
  }
}

</mosaic_0001>

<bundles_post_ra>
// kernel: tpu_custom_call.1
= control target key start
LH: loop header
LB: loop body
LE: loop exit
PB: predicated region body
PF: predicated region fallthrough
CT: control target
= control target key end

     0   :  { %12 = vsyncpa [#allocation3], 0  ;;  %s792_s0 = inlined_call_operand.vmem [shape: f32[8,2], index: 0, kind: input, shape index: {}]   ;;  %s793_s1 = inlined_call_operand.vmem [shape: f32[2,128], index: 1, kind: input, shape index: {}]   ;;  %s794_s2 = inlined_call_operand.vmem [shape: f32[1,128], index: 2, kind: input, shape index: {}]   ;;  %s795_s3 = inlined_call_operand.hbm [shape: f32[2,128,128], index: 3, kind: input, shape index: {}]   ;;  %s796_s4 = inlined_call_operand.vmem [shape: f32[2,1,128], index: 4, kind: input, shape index: {}]   ;;  %s797_s5 = inlined_call_operand.hbm [shape: f32[128,128], index: 5, kind: input, shape index: {}]   ;;  %s798_s6 = inlined_call_operand.vmem [shape: f32[1,128], index: 6, kind: input, shape index: {}]   ;;  %s799_s7 = inlined_call_operand.vmem [shape: f32[8,2], index: 7, kind: output, shape index: {}]  }
   0x1   :  { %13 = vsyncpa [#allocation5], 0  ;;  %s668_s24 = smov [#allocation2]   ;;  %s620_s28 = scalar_lea.hbm %s795_s3, 4096 }
   0x2   :  { %s25_s25 = sshll.u32 %s668_s24, 4  ;;  %p621_p0 = scmp.ne.s32.totalorder %s795_s3, %s620_s28  ;;  %s26_s25 = int_to_ptr.vmem [resolvable:$true] %s25_s25 }
   0x3   :  { %p624_p1 = scmp.lt.u32.totalorder %s620_s28, %s795_s3 }
   0x5   :  { %p626_p2 = pnand %p624_p1, %p621_p0 }
   0x7   :  { %629 = shalt.err (!%p626_p2)
}
   0x8   :  { %s630_s10 = scalar_lea.vmem %s26_s25, 4096  ;;  %p635_p4 = scmp.lt.s32.totalorder %s26_s25, %s26_s25 }
   0x9   :  { %p631_p3 = scmp.ne.s32.totalorder %s26_s25, %s630_s10  ;;  %p636_p5 = scmp.lt.s32.totalorder %s630_s10, %s630_s10 }
   0xb   :  { %p637_p6 = por %p636_p5, %p635_p4 }
   0xd   :  { %p638_p7 = pnand %p637_p6, %p631_p3 }
   0xf   :  { %641 = shalt.err (!%p638_p7)
}
  0x10   :  { %s669_s11 = smov 128   ;;  %s670_s12 = smov 8  }
  0x11   :  { %31 = dma.hbm_to_vmem [thread:$0]  %s795_s3, 4096, %s26_s25, [#allocation3], %s669_s11, %s669_s11, %s670_s12  }
  0x12   :  { %s671_s15 = smov [#allocation4]   ;;  %s642_s19 = scalar_lea.hbm %s797_s5, 2048 }
  0x13   :  { %s39_s16 = sshll.u32 %s671_s15, 4  ;;  %p643_p8 = scmp.ne.s32.totalorder %s797_s5, %s642_s19  ;;  %s40_s16 = int_to_ptr.vmem [resolvable:$true] %s39_s16 }
  0x14   :  { %p646_p9 = scmp.lt.u32.totalorder %s642_s19, %s797_s5 }
  0x16   :  { %p648_p10 = pnand %p646_p9, %p643_p8 }
  0x18   :  { %651 = shalt.err (!%p648_p10)
}
  0x19   :  { %s652_s24 = scalar_lea.vmem %s40_s16, 2048  ;;  %p657_p12 = scmp.lt.s32.totalorder %s40_s16, %s40_s16 }
  0x1a   :  { %p653_p11 = scmp.ne.s32.totalorder %s40_s16, %s652_s24  ;;  %p658_p13 = scmp.lt.s32.totalorder %s652_s24, %s652_s24 }
  0x1c   :  { %p659_p0 = por %p658_p13, %p657_p12 }
  0x1e   :  { %p660_p1 = pnand %p659_p0, %p653_p11 }
  0x20   :  { %663 = shalt.err (!%p660_p1)
}
  0x21   :  { %45 = dma.hbm_to_vmem [thread:$0]  %s797_s5, 2048, %s40_s16, [#allocation5], %s669_s11, %s669_s11, %s670_s12  }
  0x22   :  { %664 = dma.done.wait [#allocation3], 4096  }
  0x23   :  { %665 = vsyncadd [#allocation3], 4294963200 }
  0x24   :  { %666 = dma.done.wait [#allocation5], 2048  }
  0x25   :  { %667 = vsyncadd [#allocation5], 4294965248  ;;  %v672_v0 = vmov 0   ;;  %v673_v1 = vmov 0.0|0.0   ;;  %v54_v2 = vld [vmem:[%s792_s0] sm:$0xff]  ;;  %v86_v4 = vld [vmem:[#allocation2 + $0x8] sm:$0xff]  ;;  %v61_v50 = vlaneseq }
  0x26   :  { %618 = vset.pattern.permute.xlu0 %v672_v0  ;;  %537 = vmatprep.subr.bf16.mxu0 %v673_v1  ;;  %v85_v3 = vld [vmem:[#allocation2] sm:$0xff]  ;;  %v87_v6 = vld [vmem:[#allocation2 + $0x10] sm:$0xff]  ;;  %v88_v7 = vld [vmem:[#allocation2 + $0x18] sm:$0xff]  ;;  %v674_v11 = vmov 1   ;;  %vm675_vm0 = vmmov 0   ;;  %v676_v15 = vmov 0.0  }
  0x27   :  { %561 = vmatprep.subr.bf16.mxu1 %v673_v1  ;;  %58 = vperm.xlu0 %618, %v54_v2   ;;  %v538_v5 = vpack.c.bf16 %v86_v4, %v85_v3  ;;  %v541_v8 = vpack.c.bf16 %v88_v7, %v87_v6  ;;  %v89_v9 = vld [vmem:[#allocation2 + $0x20] sm:$0xff]  ;;  %v90_v10 = vld [vmem:[#allocation2 + $0x28] sm:$0xff]  ;;  %v91_v13 = vld [vmem:[#allocation2 + $0x30] sm:$0xff]  ;;  %v62_v51 = vshrl.u32 %v61_v50, 7  ;;  %vm368_vm1 = vcmask 15360  }
  0x28   :  { %v544_v12 = vpack.c.bf16 %v90_v10, %v89_v9  ;;  %v92_v14 = vld [vmem:[#allocation2 + $0x38] sm:$0xff]  ;;  %464 = vmatprep.mubr.msk.f32.mxu0 %vm675_vm0, %v676_v15  ;;  %499 = vmatprep.mubr.msk.f32.mxu1 %vm675_vm0, %v676_v15  ;;  %v93_v17 = vld [vmem:[#allocation2 + $0x40] sm:$0xff]  ;;  %v94_v18 = vld [vmem:[#allocation2 + $0x48] sm:$0xff] }
  0x29   :  { %539 = vmatpush3.bf16.msra.mxu0 %v538_v5  ;;  %v547_v16 = vpack.c.bf16 %v92_v14, %v91_v13  ;;  %v180_v19 = vld [vmem:[#allocation2 + $0x80] sm:$0xff]  ;;  %v181_v20 = vld [vmem:[#allocation2 + $0x88] sm:$0xff]  ;;  %v182_v21 = vld [vmem:[#allocation2 + $0x90] sm:$0xff]  ;;  %v550_v22 = vpack.c.bf16 %v94_v18, %v93_v17  ;;  %v63_v52 = vsub.s32 0, %v62_v51  ;;  %v72_v53 = vsub.s32 1, %v62_v51 }
  0x2a   :  { %540 = vmatprep.subr.bf16.mxu0 %v673_v1  ;;  %v562_v23 = vpack.c.bf16 %v181_v20, %v180_v19  ;;  %v183_v24 = vld [vmem:[#allocation2 + $0x98] sm:$0xff]  ;;  %v95_v25 = vld [vmem:[#allocation2 + $0x50] sm:$0xff]  ;;  %v184_v28 = vld [vmem:[#allocation2 + $0xa0] sm:$0xff] }
  0x2b   :  { %619 = vset.pattern.permute.xlu0 %v674_v11  ;;  %v96_v26 = vld [vmem:[#allocation2 + $0x58] sm:$0xff]  ;;  %v565_v27 = vpack.c.bf16 %v183_v24, %v182_v21  ;;  %v185_v29 = vld [vmem:[#allocation2 + $0xa8] sm:$0xff]  ;;  %v97_v31 = vld [vmem:[#allocation2 + $0x60] sm:$0xff] }
  0x2c   :  { %67 = vperm.xlu0 %619, %v54_v2   ;;  %563 = vmatpush3.bf16.msra.mxu1 %v562_v23  ;;  %v553_v30 = vpack.c.bf16 %v96_v26, %v95_v25  ;;  %v98_v32 = vld [vmem:[#allocation2 + $0x68] sm:$0xff]  ;;  %v568_v33 = vpack.c.bf16 %v185_v29, %v184_v28  ;;  %v186_v34 = vld [vmem:[#allocation2 + $0xb0] sm:$0xff]  ;;  %v187_v35 = vld [vmem:[#allocation2 + $0xb8] sm:$0xff] }
  0x2d   :  { %542 = vmatpush3.bf16.msra.mxu0 %v541_v8  ;;  %564 = vmatprep.subr.bf16.mxu1 %v673_v1  ;;  %v556_v36 = vpack.c.bf16 %v98_v32, %v97_v31  ;;  %v99_v37 = vld [vmem:[#allocation2 + $0x70] sm:$0xff]  ;;  %v100_v38 = vld [vmem:[#allocation2 + $0x78] sm:$0xff]  ;;  %v571_v39 = vpack.c.bf16 %v187_v35, %v186_v34  ;;  %v188_v40 = vld [vmem:[#allocation2 + $0xc0] sm:$0xff] }
  0x2e   :  { %543 = vmatprep.subr.bf16.mxu0 %v673_v1  ;;  %v189_v41 = vld [vmem:[#allocation2 + $0xc8] sm:$0xff]  ;;  %v559_v42 = vpack.c.bf16 %v100_v38, %v99_v37  ;;  %v190_v44 = vld [vmem:[#allocation2 + $0xd0] sm:$0xff]  ;;  %v191_v45 = vld [vmem:[#allocation2 + $0xd8] sm:$0xff] }
  0x2f   :  { %v574_v43 = vpack.c.bf16 %v189_v41, %v188_v40  ;;  %v577_v46 = vpack.c.bf16 %v191_v45, %v190_v44  ;;  %v192_v47 = vld [vmem:[#allocation2 + $0xe0] sm:$0xff]  ;;  %v193_v48 = vld [vmem:[#allocation2 + $0xe8] sm:$0xff]  ;;  %v194_v2 = vld [vmem:[#allocation2 + $0xf0] sm:$0xff] }
  0x30   :  { %566 = vmatpush3.bf16.msra.mxu1 %v565_v27  ;;  %v580_v49 = vpack.c.bf16 %v193_v48, %v192_v47  ;;  %v55_v54 = vld [vmem:[%s793_s1] sm:$0x3]  ;;  %v195_v3 = vld [vmem:[#allocation2 + $0xf8] sm:$0xff]  ;;  %v276_v6 = vld [vmem:[#allocation4 + $0x8] sm:$0xff] }
  0x31   :  { %545 = vmatpush3.bf16.msra.mxu0 %v544_v12  ;;  %567 = vmatprep.subr.bf16.mxu1 %v673_v1  ;;  %v64_v56 = vrot.slane %v55_v54, %v63_v52  ;;  %v73_v57 = vrot.slane %v55_v54, %v72_v53  ;;  %v376_v61 = vld [vmem:[%s794_s2] ss:$0 sm:$0xff]  ;;  %v583_v4 = vpack.c.bf16 %v195_v3, %v194_v2  ;;  %v277_v7 = vld [vmem:[#allocation4 + $0x10] sm:$0xff]  ;;  %v278_v9 = vld [vmem:[#allocation4 + $0x18] sm:$0xff] }
  0x32   :  { %546 = vmatprep.subr.bf16.mxu0 %v673_v1  ;;  %v275_v5 = vld [vmem:[#allocation4] sm:$0xff]  ;;  %v589_v10 = vpack.c.bf16 %v278_v9, %v277_v7  ;;  %v280_v12 = vld [vmem:[#allocation4 + $0x28] sm:$0xff]  ;;  %v281_v14 = vld [vmem:[#allocation4 + $0x30] sm:$0xff] }
  0x33   :  { %v586_v8 = vpack.c.bf16 %v276_v6, %v275_v5  ;;  %v279_v11 = vld [vmem:[#allocation4 + $0x20] sm:$0xff]  ;;  %v284_v18 = vld [vmem:[#allocation4 + $0x48] sm:$0xff]  ;;  %v285_v20 = vld [vmem:[#allocation4 + $0x50] sm:$0xff] }
  0x34   :  { %569 = vmatpush3.bf16.msra.mxu1 %v568_v33  ;;  %v592_v13 = vpack.c.bf16 %v280_v12, %v279_v11  ;;  %v283_v17 = vld [vmem:[#allocation4 + $0x40] sm:$0xff]  ;;  %v286_v21 = vld [vmem:[#allocation4 + $0x58] sm:$0xff]  ;;  %v288_v24 = vld [vmem:[#allocation4 + $0x68] sm:$0xff] }
  0x35   :  { %548 = vmatpush3.bf16.msra.mxu0 %v547_v16  ;;  %570 = vmatprep.subr.bf16.mxu1 %v673_v1  ;;  %v598_v19 = vpack.c.bf16 %v284_v18, %v283_v17  ;;  %v287_v23 = vld [vmem:[#allocation4 + $0x60] sm:$0xff]  ;;  %v289_v31 = vld [vmem:[#allocation4 + $0x70] sm:$0xff]  ;;  %v290_v32 = vld [vmem:[#allocation4 + $0x78] sm:$0xff] }
  0x36   :  { %549 = vmatprep.subr.bf16.mxu0 %v673_v1  ;;  %v604_v25 = vpack.c.bf16 %v288_v24, %v287_v23  ;;  %v377_v26 = vld [vmem:[%s796_s4] ss:$0 sm:$0xff]  ;;  %v607_v33 = vpack.c.bf16 %v290_v32, %v289_v31  ;;  %v379_v34 = vld [vmem:[%s796_s4 + $0x1] ss:$0 sm:$0xff] }
  0x37   :  { %v380_v38 = vld [vmem:[%s798_s6] ss:$0 sm:$0xff] }
  0x38   :  { %572 = vmatpush3.bf16.msra.mxu1 %v571_v39 }
  0x39   :  { %551 = vmatpush3.bf16.msra.mxu0 %v550_v22  ;;  %573 = vmatprep.subr.bf16.mxu1 %v673_v1  ;;  %v601_v22 = vpack.c.bf16 %v286_v21, %v285_v20 }
  0x3a   :  { %552 = vmatprep.subr.bf16.mxu0 %v673_v1 }
  0x3c   :  { %575 = vmatpush3.bf16.msra.mxu1 %v574_v43 }
  0x3d   :  { %554 = vmatpush3.bf16.msra.mxu0 %v553_v30  ;;  %576 = vmatprep.subr.bf16.mxu1 %v673_v1 }
  0x3e   :  { %555 = vmatprep.subr.bf16.mxu0 %v673_v1 }
  0x40   :  { %578 = vmatpush3.bf16.msra.mxu1 %v577_v46 }
  0x41   :  { %557 = vmatpush3.bf16.msra.mxu0 %v556_v36  ;;  %579 = vmatprep.subr.bf16.mxu1 %v673_v1 }
  0x42   :  { %558 = vmatprep.subr.bf16.mxu0 %v673_v1 }
  0x44   :  { %581 = vmatpush3.bf16.msra.mxu1 %v580_v49 }
  0x45   :  { %560 = vmatpush3.bf16.msra.mxu0 %v559_v42  ;;  %582 = vmatprep.subr.bf16.mxu1 %v673_v1 }
  0x46   :  { %585 = vmatprep.subr.bf16.mxu0 %v673_v1 }
  0x48   :  { %584 = vmatpush3.bf16.msra.mxu1 %v583_v4 }
  0xa6   :  { %v59_v55 = vpop.permute.xlu0 %58 }
  0xa7   :  { %v65_v59 = vmul.f32 %v64_v56, %v59_v55 }
  0xab   :  { %v68_v58 = vpop.permute.xlu0 %67 }
  0xac   :  { %v74_v60 = vmul.f32 %v73_v57, %v68_v58 }
  0xae   :  { %v75_v62 = vadd.f32 %v74_v60, %v65_v59 }
  0xb0   :  { %v83_v63 = vadd.f32 %v376_v61, %v75_v62 }
  0xb2   :  { %v84_v0 = vmax.f32 %v83_v63, 0.0 }
  0xb4   :  { %465 = vmatmul.mubr.f32.vlgmr.msra.gmra.mrb[0].mxu0 %v84_v0 }
  0xb5   :  { %534 = vmatprep.mubr.msk.f32.mxu0 %vm675_vm0, %v676_v15  ;;  %587 = vmatpush3.bf16.msra.mxu0 %v586_v8  ;;  %v282_v15 = vld [vmem:[#allocation4 + $0x38] sm:$0xff] }
  0xb6   :  { %588 = vmatprep.subr.bf16.mxu0 %v673_v1  ;;  %v595_v16 = vpack.c.bf16 %v282_v15, %v281_v14 }
  0xb9   :  { %590 = vmatpush3.bf16.msra.mxu0 %v589_v10 }
  0xba   :  { %591 = vmatprep.subr.bf16.mxu0 %v673_v1 }
  0xbd   :  { %593 = vmatpush3.bf16.msra.mxu0 %v592_v13 }
  0xbe   :  { %594 = vmatprep.subr.bf16.mxu0 %v673_v1 }
  0xc1   :  { %596 = vmatpush3.bf16.msra.mxu0 %v595_v16 }
  0xc2   :  { %597 = vmatprep.subr.bf16.mxu0 %v673_v1 }
  0xc5   :  { %599 = vmatpush3.bf16.msra.mxu0 %v598_v19 }
  0xc6   :  { %600 = vmatprep.subr.bf16.mxu0 %v673_v1 }
  0xc9   :  { %602 = vmatpush3.bf16.msra.mxu0 %v601_v22 }
  0xca   :  { %603 = vmatprep.subr.bf16.mxu0 %v673_v1 }
  0xcd   :  { %605 = vmatpush3.bf16.msra.mxu0 %v604_v25 }
  0xce   :  { %606 = vmatprep.subr.bf16.mxu0 %v673_v1 }
  0xd1   :  { %608 = vmatpush3.bf16.msra.mxu0 %v607_v33 }
 0x187   :  { %v174_v27 = vpop.f32.mrb[0].mxu0 }
 0x188   :  { %v175_v28 = vadd.f32 %v377_v26, %v174_v27  ;;  %v466_v29 = vpop.f32.mrb[1].mxu0 }
 0x18a   :  { %v178_v30 = vmax.f32 %v175_v28, 0.0 }
 0x18c   :  { %500 = vmatmul.mubr.f32.vlgmr.msra.gmra.mrb[0].mxu1 %v178_v30 }
 0x25f   :  { %v270_v35 = vpop.f32.mrb[0].mxu1 }
 0x260   :  { %v271_v36 = vadd.f32 %v379_v34, %v270_v35  ;;  %v501_v1 = vpop.f32.mrb[1].mxu1 }
 0x262   :  { %v274_v37 = vmax.f32 %v271_v36, 0.0 }
 0x264   :  { %535 = vmatmul.mubr.f32.vlgmr.msra.gmra.mrb[2].mxu0 %v274_v37 }
 0x337   :  { %v364_v39 = vpop.f32.mrb[2].mxu0 }
 0x338   :  { %v365_v40 = vadd.f32 %v380_v38, %v364_v39  ;;  %v536_v41 = vpop.f32.mrb[3].mxu0 }
 0x33a   :  { %369 = vst.msk [vmem:[%s799_s7] sm:$0xff] %vm368_vm1, %v365_v40 }
 0x33b   :  { %374 = vsyncpa [#allocation3], 1 }
 0x33c   :  { %375 = vsyncpa [#allocation5], 1 }

// kernel: tpu_custom_call.1
= control target key start
LH: loop header
LB: loop body
LE: loop exit
PB: predicated region body
PF: predicated region fallthrough
CT: control target
= control target key end

     0   :  { %12 = vsyncpa [#allocation3], 0  ;;  %s792_s0 = inlined_call_operand.vmem [shape: f32[8,2], index: 0, kind: input, shape index: {}]   ;;  %s793_s1 = inlined_call_operand.vmem [shape: f32[2,128], index: 1, kind: input, shape index: {}]   ;;  %s794_s2 = inlined_call_operand.vmem [shape: f32[1,128], index: 2, kind: input, shape index: {}]   ;;  %s795_s3 = inlined_call_operand.hbm [shape: f32[2,128,128], index: 3, kind: input, shape index: {}]   ;;  %s796_s4 = inlined_call_operand.vmem [shape: f32[2,1,128], index: 4, kind: input, shape index: {}]   ;;  %s797_s5 = inlined_call_operand.hbm [shape: f32[128,128], index: 5, kind: input, shape index: {}]   ;;  %s798_s6 = inlined_call_operand.vmem [shape: f32[1,128], index: 6, kind: input, shape index: {}]   ;;  %s799_s7 = inlined_call_operand.vmem [shape: f32[8,2], index: 7, kind: output, shape index: {}]  }
   0x1   :  { %13 = vsyncpa [#allocation5], 0  ;;  %s668_s24 = smov [#allocation2]   ;;  %s620_s28 = scalar_lea.hbm %s795_s3, 4096 }
   0x2   :  { %s25_s25 = sshll.u32 %s668_s24, 4  ;;  %p621_p0 = scmp.ne.s32.totalorder %s795_s3, %s620_s28  ;;  %s26_s25 = int_to_ptr.vmem [resolvable:$true] %s25_s25 }
   0x3   :  { %p624_p1 = scmp.lt.u32.totalorder %s620_s28, %s795_s3 }
   0x5   :  { %p626_p2 = pnand %p624_p1, %p621_p0 }
   0x7   :  { %629 = shalt.err (!%p626_p2)
}
   0x8   :  { %s630_s10 = scalar_lea.vmem %s26_s25, 4096  ;;  %p635_p4 = scmp.lt.s32.totalorder %s26_s25, %s26_s25 }
   0x9   :  { %p631_p3 = scmp.ne.s32.totalorder %s26_s25, %s630_s10  ;;  %p636_p5 = scmp.lt.s32.totalorder %s630_s10, %s630_s10 }
   0xb   :  { %p637_p6 = por %p636_p5, %p635_p4 }
   0xd   :  { %p638_p7 = pnand %p637_p6, %p631_p3 }
   0xf   :  { %641 = shalt.err (!%p638_p7)
}
  0x10   :  { %s669_s11 = smov 128   ;;  %s670_s12 = smov 8  }
  0x11   :  { %31 = dma.hbm_to_vmem [thread:$0]  %s795_s3, 4096, %s26_s25, [#allocation3], %s669_s11, %s669_s11, %s670_s12  }
  0x12   :  { %s671_s15 = smov [#allocation4]   ;;  %s642_s19 = scalar_lea.hbm %s797_s5, 2048 }
  0x13   :  { %s39_s16 = sshll.u32 %s671_s15, 4  ;;  %p643_p8 = scmp.ne.s32.totalorder %s797_s5, %s642_s19  ;;  %s40_s16 = int_to_ptr.vmem [resolvable:$true] %s39_s16 }
  0x14   :  { %p646_p9 = scmp.lt.u32.totalorder %s642_s19, %s797_s5 }
  0x16   :  { %p648_p10 = pnand %p646_p9, %p643_p8 }
  0x18   :  { %651 = shalt.err (!%p648_p10)
}
  0x19   :  { %s652_s24 = scalar_lea.vmem %s40_s16, 2048  ;;  %p657_p12 = scmp.lt.s32.totalorder %s40_s16, %s40_s16 }
  0x1a   :  { %p653_p11 = scmp.ne.s32.totalorder %s40_s16, %s652_s24  ;;  %p658_p13 = scmp.lt.s32.totalorder %s652_s24, %s652_s24 }
  0x1c   :  { %p659_p0 = por %p658_p13, %p657_p12 }
  0x1e   :  { %p660_p1 = pnand %p659_p0, %p653_p11 }
  0x20   :  { %663 = shalt.err (!%p660_p1)
}
  0x21   :  { %45 = dma.hbm_to_vmem [thread:$0]  %s797_s5, 2048, %s40_s16, [#allocation5], %s669_s11, %s669_s11, %s670_s12  }
  0x22   :  { %664 = dma.done.wait [#allocation3], 4096  }
  0x23   :  { %665 = vsyncadd [#allocation3], 4294963200 }
  0x24   :  { %666 = dma.done.wait [#allocation5], 2048  }
  0x25   :  { %667 = vsyncadd [#allocation5], 4294965248  ;;  %v672_v0 = vmov 0   ;;  %v673_v1 = vmov 0.0|0.0   ;;  %v54_v2 = vld [vmem:[%s792_s0] sm:$0xff]  ;;  %v86_v4 = vld [vmem:[#allocation2 + $0x8] sm:$0xff]  ;;  %v61_v50 = vlaneseq }
  0x26   :  { %618 = vset.pattern.permute.xlu0 %v672_v0  ;;  %537 = vmatprep.subr.bf16.mxu0 %v673_v1  ;;  %v85_v3 = vld [vmem:[#allocation2] sm:$0xff]  ;;  %v87_v6 = vld [vmem:[#allocation2 + $0x10] sm:$0xff]  ;;  %v88_v7 = vld [vmem:[#allocation2 + $0x18] sm:$0xff]  ;;  %v674_v11 = vmov 1   ;;  %vm675_vm0 = vmmov 0   ;;  %v676_v15 = vmov 0.0  }
  0x27   :  { %561 = vmatprep.subr.bf16.mxu1 %v673_v1  ;;  %58 = vperm.xlu0 %618, %v54_v2   ;;  %v538_v5 = vpack.c.bf16 %v86_v4, %v85_v3  ;;  %v541_v8 = vpack.c.bf16 %v88_v7, %v87_v6  ;;  %v89_v9 = vld [vmem:[#allocation2 + $0x20] sm:$0xff]  ;;  %v90_v10 = vld [vmem:[#allocation2 + $0x28] sm:$0xff]  ;;  %v91_v13 = vld [vmem:[#allocation2 + $0x30] sm:$0xff]  ;;  %v62_v51 = vshrl.u32 %v61_v50, 7  ;;  %vm368_vm1 = vcmask 15360  }
  0x28   :  { %v544_v12 = vpack.c.bf16 %v90_v10, %v89_v9  ;;  %v92_v14 = vld [vmem:[#allocation2 + $0x38] sm:$0xff]  ;;  %464 = vmatprep.mubr.msk.f32.mxu0 %vm675_vm0, %v676_v15  ;;  %499 = vmatprep.mubr.msk.f32.mxu1 %vm675_vm0, %v676_v15  ;;  %v93_v17 = vld [vmem:[#allocation2 + $0x40] sm:$0xff]  ;;  %v94_v18 = vld [vmem:[#allocation2 + $0x48] sm:$0xff] }
  0x29   :  { %539 = vmatpush3.bf16.msra.mxu0 %v538_v5  ;;  %v547_v16 = vpack.c.bf16 %v92_v14, %v91_v13  ;;  %v180_v19 = vld [vmem:[#allocation2 + $0x80] sm:$0xff]  ;;  %v181_v20 = vld [vmem:[#allocation2 + $0x88] sm:$0xff]  ;;  %v182_v21 = vld [vmem:[#allocation2 + $0x90] sm:$0xff]  ;;  %v550_v22 = vpack.c.bf16 %v94_v18, %v93_v17  ;;  %v63_v52 = vsub.s32 0, %v62_v51  ;;  %v72_v53 = vsub.s32 1, %v62_v51 }
  0x2a   :  { %540 = vmatprep.subr.bf16.mxu0 %v673_v1  ;;  %v562_v23 = vpack.c.bf16 %v181_v20, %v180_v19  ;;  %v183_v24 = vld [vmem:[#allocation2 + $0x98] sm:$0xff]  ;;  %v95_v25 = vld [vmem:[#allocation2 + $0x50] sm:$0xff]  ;;  %v184_v28 = vld [vmem:[#allocation2 + $0xa0] sm:$0xff] }
  0x2b   :  { %619 = vset.pattern.permute.xlu0 %v674_v11  ;;  %v96_v26 = vld [vmem:[#allocation2 + $0x58] sm:$0xff]  ;;  %v565_v27 = vpack.c.bf16 %v183_v24, %v182_v21  ;;  %v185_v29 = vld [vmem:[#allocation2 + $0xa8] sm:$0xff]  ;;  %v97_v31 = vld [vmem:[#allocation2 + $0x60] sm:$0xff] }
  0x2c   :  { %67 = vperm.xlu0 %619, %v54_v2   ;;  %563 = vmatpush3.bf16.msra.mxu1 %v562_v23  ;;  %v553_v30 = vpack.c.bf16 %v96_v26, %v95_v25  ;;  %v98_v32 = vld [vmem:[#allocation2 + $0x68] sm:$0xff]  ;;  %v568_v33 = vpack.c.bf16 %v185_v29, %v184_v28  ;;  %v186_v34 = vld [vmem:[#allocation2 + $0xb0] sm:$0xff]  ;;  %v187_v35 = vld [vmem:[#allocation2 + $0xb8] sm:$0xff] }
  0x2d   :  { %542 = vmatpush3.bf16.msra.mxu0 %v541_v8  ;;  %564 = vmatprep.subr.bf16.mxu1 %v673_v1  ;;  %v556_v36 = vpack.c.bf16 %v98_v32, %v97_v31  ;;  %v99_v37 = vld [vmem:[#allocation2 + $0x70] sm:$0xff]  ;;  %v100_v38 = vld [vmem:[#allocation2 + $0x78] sm:$0xff]  ;;  %v571_v39 = vpack.c.bf16 %v187_v35, %v186_v34  ;;  %v188_v40 = vld [vmem:[#allocation2 + $0xc0] sm:$0xff] }
  0x2e   :  { %543 = vmatprep.subr.bf16.mxu0 %v673_v1  ;;  %v189_v41 = vld [vmem:[#allocation2 + $0xc8] sm:$0xff]  ;;  %v559_v42 = vpack.c.bf16 %v100_v38, %v99_v37  ;;  %v190_v44 = vld [vmem:[#allocation2 + $0xd0] sm:$0xff]  ;;  %v191_v45 = vld [vmem:[#allocation2 + $0xd8] sm:$0xff] }
  0x2f   :  { %v574_v43 = vpack.c.bf16 %v189_v41, %v188_v40  ;;  %v577_v46 = vpack.c.bf16 %v191_v45, %v190_v44  ;;  %v192_v47 = vld [vmem:[#allocation2 + $0xe0] sm:$0xff]  ;;  %v193_v48 = vld [vmem:[#allocation2 + $0xe8] sm:$0xff]  ;;  %v194_v2 = vld [vmem:[#allocation2 + $0xf0] sm:$0xff] }
  0x30   :  { %566 = vmatpush3.bf16.msra.mxu1 %v565_v27  ;;  %v580_v49 = vpack.c.bf16 %v193_v48, %v192_v47  ;;  %v55_v54 = vld [vmem:[%s793_s1] sm:$0x3]  ;;  %v195_v3 = vld [vmem:[#allocation2 + $0xf8] sm:$0xff]  ;;  %v276_v6 = vld [vmem:[#allocation4 + $0x8] sm:$0xff] }
  0x31   :  { %545 = vmatpush3.bf16.msra.mxu0 %v544_v12  ;;  %567 = vmatprep.subr.bf16.mxu1 %v673_v1  ;;  %v64_v56 = vrot.slane %v55_v54, %v63_v52  ;;  %v73_v57 = vrot.slane %v55_v54, %v72_v53  ;;  %v376_v61 = vld [vmem:[%s794_s2] ss:$0 sm:$0xff]  ;;  %v583_v4 = vpack.c.bf16 %v195_v3, %v194_v2  ;;  %v277_v7 = vld [vmem:[#allocation4 + $0x10] sm:$0xff]  ;;  %v278_v9 = vld [vmem:[#allocation4 + $0x18] sm:$0xff] }
  0x32   :  { %546 = vmatprep.subr.bf16.mxu0 %v673_v1  ;;  %v275_v5 = vld [vmem:[#allocation4] sm:$0xff]  ;;  %v589_v10 = vpack.c.bf16 %v278_v9, %v277_v7  ;;  %v280_v12 = vld [vmem:[#allocation4 + $0x28] sm:$0xff]  ;;  %v281_v14 = vld [vmem:[#allocation4 + $0x30] sm:$0xff] }
  0x33   :  { %v586_v8 = vpack.c.bf16 %v276_v6, %v275_v5  ;;  %v279_v11 = vld [vmem:[#allocation4 + $0x20] sm:$0xff]  ;;  %v284_v18 = vld [vmem:[#allocation4 + $0x48] sm:$0xff]  ;;  %v285_v20 = vld [vmem:[#allocation4 + $0x50] sm:$0xff] }
  0x34   :  { %569 = vmatpush3.bf16.msra.mxu1 %v568_v33  ;;  %v592_v13 = vpack.c.bf16 %v280_v12, %v279_v11  ;;  %v283_v17 = vld [vmem:[#allocation4 + $0x40] sm:$0xff]  ;;  %v286_v21 = vld [vmem:[#allocation4 + $0x58] sm:$0xff]  ;;  %v288_v24 = vld [vmem:[#allocation4 + $0x68] sm:$0xff] }
  0x35   :  { %548 = vmatpush3.bf16.msra.mxu0 %v547_v16  ;;  %570 = vmatprep.subr.bf16.mxu1 %v673_v1  ;;  %v598_v19 = vpack.c.bf16 %v284_v18, %v283_v17  ;;  %v287_v23 = vld [vmem:[#allocation4 + $0x60] sm:$0xff]  ;;  %v289_v31 = vld [vmem:[#allocation4 + $0x70] sm:$0xff]  ;;  %v290_v32 = vld [vmem:[#allocation4 + $0x78] sm:$0xff] }
  0x36   :  { %549 = vmatprep.subr.bf16.mxu0 %v673_v1  ;;  %v604_v25 = vpack.c.bf16 %v288_v24, %v287_v23  ;;  %v377_v26 = vld [vmem:[%s796_s4] ss:$0 sm:$0xff]  ;;  %v607_v33 = vpack.c.bf16 %v290_v32, %v289_v31  ;;  %v379_v34 = vld [vmem:[%s796_s4 + $0x1] ss:$0 sm:$0xff] }
  0x37   :  { %v380_v38 = vld [vmem:[%s798_s6] ss:$0 sm:$0xff] }
  0x38   :  { %572 = vmatpush3.bf16.msra.mxu1 %v571_v39 }
  0x39   :  { %551 = vmatpush3.bf16.msra.mxu0 %v550_v22  ;;  %573 = vmatprep.subr.bf16.mxu1 %v673_v1  ;;  %v601_v22 = vpack.c.bf16 %v286_v21, %v285_v20 }
  0x3a   :  { %552 = vmatprep.subr.bf16.mxu0 %v673_v1 }
  0x3c   :  { %575 = vmatpush3.bf16.msra.mxu1 %v574_v43 }
  0x3d   :  { %554 = vmatpush3.bf16.msra.mxu0 %v553_v30  ;;  %576 = vmatprep.subr.bf16.mxu1 %v673_v1 }
  0x3e   :  { %555 = vmatprep.subr.bf16.mxu0 %v673_v1 }
  0x40   :  { %578 = vmatpush3.bf16.msra.mxu1 %v577_v46 }
  0x41   :  { %557 = vmatpush3.bf16.msra.mxu0 %v556_v36  ;;  %579 = vmatprep.subr.bf16.mxu1 %v673_v1 }
  0x42   :  { %558 = vmatprep.subr.bf16.mxu0 %v673_v1 }
  0x44   :  { %581 = vmatpush3.bf16.msra.mxu1 %v580_v49 }
  0x45   :  { %560 = vmatpush3.bf16.msra.mxu0 %v559_v42  ;;  %582 = vmatprep.subr.bf16.mxu1 %v673_v1 }
  0x46   :  { %585 = vmatprep.subr.bf16.mxu0 %v673_v1 }
  0x48   :  { %584 = vmatpush3.bf16.msra.mxu1 %v583_v4 }
  0xa6   :  { %v59_v55 = vpop.permute.xlu0 %58 }
  0xa7   :  { %v65_v59 = vmul.f32 %v64_v56, %v59_v55 }
  0xab   :  { %v68_v58 = vpop.permute.xlu0 %67 }
  0xac   :  { %v74_v60 = vmul.f32 %v73_v57, %v68_v58 }
  0xae   :  { %v75_v62 = vadd.f32 %v74_v60, %v65_v59 }
  0xb0   :  { %v83_v63 = vadd.f32 %v376_v61, %v75_v62 }
  0xb2   :  { %v84_v0 = vmax.f32 %v83_v63, 0.0 }
  0xb4   :  { %465 = vmatmul.mubr.f32.vlgmr.msra.gmra.mrb[0].mxu0 %v84_v0 }
  0xb5   :  { %534 = vmatprep.mubr.msk.f32.mxu0 %vm675_vm0, %v676_v15  ;;  %587 = vmatpush3.bf16.msra.mxu0 %v586_v8  ;;  %v282_v15 = vld [vmem:[#allocation4 + $0x38] sm:$0xff] }
  0xb6   :  { %588 = vmatprep.subr.bf16.mxu0 %v673_v1  ;;  %v595_v16 = vpack.c.bf16 %v282_v15, %v281_v14 }
  0xb9   :  { %590 = vmatpush3.bf16.msra.mxu0 %v589_v10 }
  0xba   :  { %591 = vmatprep.subr.bf16.mxu0 %v673_v1 }
  0xbd   :  { %593 = vmatpush3.bf16.msra.mxu0 %v592_v13 }
  0xbe   :  { %594 = vmatprep.subr.bf16.mxu0 %v673_v1 }
  0xc1   :  { %596 = vmatpush3.bf16.msra.mxu0 %v595_v16 }
  0xc2   :  { %597 = vmatprep.subr.bf16.mxu0 %v673_v1 }
  0xc5   :  { %599 = vmatpush3.bf16.msra.mxu0 %v598_v19 }
  0xc6   :  { %600 = vmatprep.subr.bf16.mxu0 %v673_v1 }
  0xc9   :  { %602 = vmatpush3.bf16.msra.mxu0 %v601_v22 }
  0xca   :  { %603 = vmatprep.subr.bf16.mxu0 %v673_v1 }
  0xcd   :  { %605 = vmatpush3.bf16.msra.mxu0 %v604_v25 }
  0xce   :  { %606 = vmatprep.subr.bf16.mxu0 %v673_v1 }
  0xd1   :  { %608 = vmatpush3.bf16.msra.mxu0 %v607_v33 }
 0x187   :  { %v174_v27 = vpop.f32.mrb[0].mxu0 }
 0x188   :  { %v175_v28 = vadd.f32 %v377_v26, %v174_v27  ;;  %v466_v29 = vpop.f32.mrb[1].mxu0 }
 0x18a   :  { %v178_v30 = vmax.f32 %v175_v28, 0.0 }
 0x18c   :  { %500 = vmatmul.mubr.f32.vlgmr.msra.gmra.mrb[0].mxu1 %v178_v30 }
 0x25f   :  { %v270_v35 = vpop.f32.mrb[0].mxu1 }
 0x260   :  { %v271_v36 = vadd.f32 %v379_v34, %v270_v35  ;;  %v501_v1 = vpop.f32.mrb[1].mxu1 }
 0x262   :  { %v274_v37 = vmax.f32 %v271_v36, 0.0 }
 0x264   :  { %535 = vmatmul.mubr.f32.vlgmr.msra.gmra.mrb[2].mxu0 %v274_v37 }
 0x337   :  { %v364_v39 = vpop.f32.mrb[2].mxu0 }
 0x338   :  { %v365_v40 = vadd.f32 %v380_v38, %v364_v39  ;;  %v536_v41 = vpop.f32.mrb[3].mxu0 }
 0x33a   :  { %369 = vst.msk [vmem:[%s799_s7] sm:$0xff] %vm368_vm1, %v365_v40 }
 0x33b   :  { %374 = vsyncpa [#allocation3], 1 }
 0x33c   :  { %375 = vsyncpa [#allocation5], 1 }

</bundles_post_ra>
